<compile_context>
chip_gen: v7x
topology: tpu7x:2x2x1
jax: 0.10.0
libtpu: 0.0.40
codegen_flags: <defaults>
</compile_context>

<pallas_src>
import functools

import numpy as np

import jax
import jax.numpy as jnp
from jax.experimental import pallas as pl
from jax.experimental.pallas import tpu as pltpu

BN_EPS = 1e-5  # nn.BatchNorm2d default eps


# ----------------------------------------------------------------------------- kernel

def _c3_kernel(*refs, n, H, W, shortcut):
    """Entire C3 forward for ONE image in lane-dense (C, H*W) layout.

    refs = (x, masks, w1, b1, w2, b2, [wb1, bb1, w9, bb2]*n, w3a, w3b, b3,
            o, slab_scratch)
      x    : (1, c1, M)       M = H*W on the lane axis
      masks: (9, M)           f32 {0,1} halo-validity per 3x3 tap
      w*   : (Cout, Cin[*9])  BN-folded weights;  b*: (Cout, 1) BN-folded biases
      o    : (1, c2, M)
      slab : (9*c_, M)        VMEM im2col scratch
    """
    x_ref, mask_ref, w1_ref, b1_ref, w2_ref, b2_ref = refs[:6]
    rest = refs[6:]
    bneck_refs = rest[:4 * n]
    w3a_ref, w3b_ref, b3_ref, o_ref, slab_ref = rest[4 * n:]
    M = H * W

    def conv_bn_silu(w_ref, b_ref, v):
        # 1x1 conv (BN folded) + SiLU:  (Cout, Cin) @ (Cin, M) -> lane-dense output.
        z = jnp.dot(w_ref[...], v, preferred_element_type=jnp.float32) + b_ref[...]
        return z * jax.nn.sigmoid(z)

    x = x_ref[0]                                    # (c1, M)
    y1 = conv_bn_silu(w1_ref, b1_ref, x)            # C3.cv1
    y2 = conv_bn_silu(w2_ref, b2_ref, x)            # C3.cv2

    c_ = y1.shape[0]
    b = y1
    for j in range(n):                              # Bottleneck chain (static unroll)
        wb1_ref, bb1_ref, w9_ref, bb2_ref = bneck_refs[4 * j:4 * j + 4]
        t = conv_bn_silu(wb1_ref, bb1_ref, b)       # Bottleneck.cv1 (1x1)

        # Bottleneck.cv2 (3x3, pad=1) as im2col: 9 lane-rotated, halo-masked copies
        # of t stacked into a (9*c_, M) slab, then ONE K = 9*c_ MXU matmul.
        for k in range(9):
            ky, kx = divmod(k, 3)
            off = (ky - 1) * W + (kx - 1)           # shift in flattened spatial index
            s = t if off == 0 else pltpu.roll(t, shift=(-off) % M, axis=1)
            if off != 0:
                s = s * mask_ref[k:k + 1, :]        # zero the out-of-image halo taps
            slab_ref[k * c_:(k + 1) * c_, :] = s
        z = jnp.dot(w9_ref[...], slab_ref[...],
                    preferred_element_type=jnp.float32) + bb2_ref[...]
        z = z * jax.nn.sigmoid(z)
        b = b + z if shortcut else z                # residual add

    # C3.cv3 on cat([b, y2], channel) without materializing the concat.
    z = (jnp.dot(w3a_ref[...], b, preferred_element_type=jnp.float32)
         + jnp.dot(w3b_ref[...], y2, preferred_element_type=jnp.float32)
         + b3_ref[...])
    o_ref[0] = (z * jax.nn.sigmoid(z)).astype(o_ref.dtype)


# ----------------------------------------------------------------------- pallas wrapper

def _tap_masks(H, W):
    """(9, H*W) f32 validity masks for the 3x3 taps (zero-padding at the halo)."""
    M = H * W
    ys, xs = np.divmod(np.arange(M, dtype=np.int64), W)
    masks = np.zeros((9, M), np.float32)
    for k in range(9):
        ky, kx = divmod(k, 3)
        dy, dx = ky - 1, kx - 1
        masks[k] = ((ys + dy >= 0) & (ys + dy < H) &
                    (xs + dx >= 0) & (xs + dx < W)).astype(np.float32)
    return jnp.asarray(masks)


@functools.partial(jax.jit, static_argnames=("shortcut",))
def c3_forward(x, params, *, shortcut=True):
    """x: (N, c1, H, W) float32 NCHW.  Returns (N, c2, H, W) NCHW."""
    n_img, c1, H, W = x.shape
    M = H * W
    xm = x.reshape(n_img, c1, M)                    # free reshape, stays channel-major

    w1, b1 = params["w1"], params["b1"]
    w2, b2 = params["w2"], params["b2"]
    w3a, w3b, b3 = params["w3a"], params["w3b"], params["b3"]
    bnecks = params["bottlenecks"]
    n = len(bnecks)
    c_ = w1.shape[0]
    c2 = w3a.shape[0]
    masks = _tap_masks(H, W)
    flat_b = [a for bn in bnecks for a in bn]

    def full_spec(a):                               # whole (small) array resident in VMEM
        return pl.BlockSpec(a.shape, lambda i: (0,) * a.ndim)

    in_specs = ([pl.BlockSpec((1, c1, M), lambda i: (i, 0, 0)),
                 full_spec(masks), full_spec(w1), full_spec(b1),
                 full_spec(w2), full_spec(b2)]
                + [full_spec(a) for a in flat_b]
                + [full_spec(w3a), full_spec(w3b), full_spec(b3)])

    flops = 2 * n_img * M * (2 * c1 * c_ + n * (c_ * c_ + 9 * c_ * c_) + 2 * c_ * c2)
    trans = n_img * M * (2 * c_ + 2 * n * c_ + c2)
    bytes_accessed = 4 * (xm.size + masks.size + w1.size + b1.size + w2.size + b2.size
                          + sum(a.size for a in flat_b)
                          + w3a.size + w3b.size + b3.size + n_img * c2 * M)

    out = pl.pallas_call(
        functools.partial(_c3_kernel, n=n, H=H, W=W, shortcut=shortcut),
        out_shape=jax.ShapeDtypeStruct((n_img, c2, M), x.dtype),
        grid_spec=pltpu.PrefetchScalarGridSpec(
            num_scalar_prefetch=0,
            grid=(n_img,),                          # one image per grid step
            in_specs=in_specs,
            out_specs=pl.BlockSpec((1, c2, M), lambda i: (i, 0, 0)),
            scratch_shapes=[pltpu.VMEM((9 * c_, M), jnp.float32)]),
        compiler_params=pltpu.CompilerParams(dimension_semantics=("parallel",)),
        cost_estimate=pl.CostEstimate(flops=flops, transcendentals=trans,
                                      bytes_accessed=bytes_accessed),
    )(xm, masks, w1, b1, w2, b2, *flat_b, w3a, w3b, b3)

    return out.reshape(n_img, c2, H, W)


# ------------------------------------------------------------------- params + BN folding

def init_c3_raw_params(key, c1, c2, n=1, e=0.5):
    """PyTorch-equivalent raw parameters (conv weights OIHW + BN stats)."""
    c_ = int(c2 * e)
    keys = iter(jax.random.split(key, 8 * (3 + 2 * n)))

    def conv_bn(cin, cout, k):
        wkey, gk, bk, mk, vk = (next(keys) for _ in range(5))
        return dict(
            w=jax.random.normal(wkey, (cout, cin, k, k), jnp.float32) / (cin * k * k) ** 0.5,
            gamma=1.0 + 0.1 * jax.random.normal(gk, (cout,), jnp.float32),
            beta=0.1 * jax.random.normal(bk, (cout,), jnp.float32),
            mean=0.1 * jax.random.normal(mk, (cout,), jnp.float32),
            var=jnp.abs(jax.random.normal(vk, (cout,), jnp.float32)) + 0.5,
        )

    return dict(
        cv1=conv_bn(c1, c_, 1),
        cv2=conv_bn(c1, c_, 1),
        cv3=conv_bn(2 * c_, c2, 1),
        m=[dict(cv1=conv_bn(c_, c_, 1), cv2=conv_bn(c_, c_, 3)) for _ in range(n)],
    )


def _bn_scale_bias(p):
    s = p["gamma"] * jax.lax.rsqrt(p["var"] + BN_EPS)
    return s, p["beta"] - p["mean"] * s


def _fold_1x1(p):
    s, bias = _bn_scale_bias(p)
    w = p["w"][:, :, 0, 0] * s[:, None]             # (Cout, Cin)
    return w, bias[:, None]                         # bias (Cout, 1)


def _fold_3x3(p):
    s, bias = _bn_scale_bias(p)
    cout, cin = p["w"].shape[:2]
    # tap (ky, kx) occupies columns [(ky*3+kx)*Cin : +Cin] of (Cout, 9*Cin)
    w9 = jnp.transpose(p["w"], (0, 2, 3, 1)).reshape(cout, 9 * cin) * s[:, None]
    return w9, bias[:, None]


def fold_c3_params(raw):
    w1, b1 = _fold_1x1(raw["cv1"])
    w2, b2 = _fold_1x1(raw["cv2"])
    w3, b3 = _fold_1x1(raw["cv3"])
    c_ = w1.shape[0]
    bottlenecks = tuple(_fold_1x1(m["cv1"]) + _fold_3x3(m["cv2"]) for m in raw["m"])
    return dict(w1=w1, b1=b1, w2=w2, b2=b2, bottlenecks=bottlenecks,
                w3a=w3[:, :c_], w3b=w3[:, c_:], b3=b3)


# ---------------------------------------------------------------------------- reference

def _ref_conv(x, p, k):
    pad = k // 2
    z = jax.lax.conv_general_dilated(
        x, p["w"], window_strides=(1, 1), padding=((pad, pad), (pad, pad)),
        dimension_numbers=("NCHW", "OIHW", "NCHW"),
        precision=jax.lax.Precision.HIGHEST)
    s = p["gamma"] * jax.lax.rsqrt(p["var"] + BN_EPS)
    z = z * s[None, :, None, None] + (p["beta"] - p["mean"] * s)[None, :, None, None]
    return z * jax.nn.sigmoid(z)


def _reference_c3(x, raw, shortcut=True):
    y1 = _ref_conv(x, raw["cv1"], 1)
    y2 = _ref_conv(x, raw["cv2"], 1)
    b = y1
    for mm in raw["m"]:
        t = _ref_conv(b, mm["cv1"], 1)
        u = _ref_conv(t, mm["cv2"], 3)
        b = b + u if shortcut else u
    return _ref_conv(jnp.concatenate([b, y2], axis=1), raw["cv3"], 1)


# --------------------------------------------------------------------------------- main

if __name__ == "__main__":
    # C3(c1=16, c2=32, n=1, shortcut=True, g=1, e=0.5)  ->  c_ = 16
    N, c1, c2, H, W = 2, 16, 32, 16, 16
    n_bottlenecks = 1
    shortcut = True

    key = jax.random.PRNGKey(0)
    kx, kp = jax.random.split(key)
    x = jax.random.normal(kx, (N, c1, H, W), dtype=jnp.float32)
    raw = init_c3_raw_params(kp, c1, c2, n=n_bottlenecks)

    params = fold_c3_params(raw)
    out = c3_forward(x, params, shortcut=shortcut)
    out = jax.block_until_ready(out)

    ref = _reference_c3(x, raw, shortcut=shortcut)
    assert out.shape == (N, c2, H, W), out.shape
    max_err = float(jnp.max(jnp.abs(out - ref)))
    assert jnp.allclose(out, ref, atol=1e-3, rtol=1e-3), max_err

    print("KERNEL_OK")
</pallas_src>

<mosaic_0001>
module attributes {stable_mosaic.version = 11 : i64} {
  func.func @_c3_kernel(%arg0: i32, %arg1: memref<1x16x256xf32, #tpu.memory_space<vmem>>, %arg2: memref<9x256xf32, #tpu.memory_space<vmem>>, %arg3: memref<16x16xf32, #tpu.memory_space<vmem>>, %arg4: memref<16x1xf32, #tpu.memory_space<vmem>>, %arg5: memref<16x16xf32, #tpu.memory_space<vmem>>, %arg6: memref<16x1xf32, #tpu.memory_space<vmem>>, %arg7: memref<16x16xf32, #tpu.memory_space<vmem>>, %arg8: memref<16x1xf32, #tpu.memory_space<vmem>>, %arg9: memref<16x144xf32, #tpu.memory_space<vmem>>, %arg10: memref<16x1xf32, #tpu.memory_space<vmem>>, %arg11: memref<32x16xf32, #tpu.memory_space<vmem>>, %arg12: memref<32x16xf32, #tpu.memory_space<vmem>>, %arg13: memref<32x1xf32, #tpu.memory_space<vmem>>, %arg14: memref<1x32x256xf32, #tpu.memory_space<vmem>>, %arg15: memref<144x256xf32, #tpu.memory_space<vmem>>) attributes {dimension_semantics = [#tpu.dimension_semantics<parallel>], iteration_bounds = array<i64: 2>, scalar_prefetch = 0 : i64, scratch_operands = 1 : i64, tpu.core_type = #tpu.core_type<tc>, window_params = [{transform_indices = @transform_0, window_bounds = array<i64: 1, 16, 256>}, {pipeline_mode = #tpu.pipeline_mode<synchronous>, transform_indices = @transform_1, window_bounds = array<i64: 9, 256>}, {pipeline_mode = #tpu.pipeline_mode<synchronous>, transform_indices = @transform_2, window_bounds = array<i64: 16, 16>}, {pipeline_mode = #tpu.pipeline_mode<synchronous>, transform_indices = @transform_3, window_bounds = array<i64: 16, 1>}, {pipeline_mode = #tpu.pipeline_mode<synchronous>, transform_indices = @transform_4, window_bounds = array<i64: 16, 16>}, {pipeline_mode = #tpu.pipeline_mode<synchronous>, transform_indices = @transform_5, window_bounds = array<i64: 16, 1>}, {pipeline_mode = #tpu.pipeline_mode<synchronous>, transform_indices = @transform_6, window_bounds = array<i64: 16, 16>}, {pipeline_mode = #tpu.pipeline_mode<synchronous>, transform_indices = @transform_7, window_bounds = array<i64: 16, 1>}, {pipeline_mode = #tpu.pipeline_mode<synchronous>, transform_indices = @transform_8, window_bounds = array<i64: 16, 144>}, {pipeline_mode = #tpu.pipeline_mode<synchronous>, transform_indices = @transform_9, window_bounds = array<i64: 16, 1>}, {pipeline_mode = #tpu.pipeline_mode<synchronous>, transform_indices = @transform_10, window_bounds = array<i64: 32, 16>}, {pipeline_mode = #tpu.pipeline_mode<synchronous>, transform_indices = @transform_11, window_bounds = array<i64: 32, 16>}, {pipeline_mode = #tpu.pipeline_mode<synchronous>, transform_indices = @transform_12, window_bounds = array<i64: 32, 1>}, {transform_indices = @transform_13, window_bounds = array<i64: 1, 32, 256>}]} {
    %c0 = arith.constant 0 : index
    %c0_0 = arith.constant 0 : index
    %c0_1 = arith.constant 0 : index
    %0 = vector.load %arg1[%c0, %c0_0, %c0_1] : memref<1x16x256xf32, #tpu.memory_space<vmem>>, vector<1x16x256xf32>
    %1 = vector.shape_cast %0 : vector<1x16x256xf32> to vector<16x256xf32>
    %c0_2 = arith.constant 0 : index
    %c0_3 = arith.constant 0 : index
    %2 = vector.load %arg3[%c0_2, %c0_3] : memref<16x16xf32, #tpu.memory_space<vmem>>, vector<16x16xf32>
    %cst = arith.constant dense<0.000000e+00> : vector<16x256xf32>
    %3 = tpu.matmul %2, %1, %cst {dimension_numbers = #tpu.dot_dimension_numbers<[1], [0], [0], [1], [0, 0, 1, 1], [], []>} : vector<16x16xf32>, vector<16x256xf32>, vector<16x256xf32> -> vector<16x256xf32>
    %c0_4 = arith.constant 0 : index
    %c0_5 = arith.constant 0 : index
    %4 = vector.load %arg4[%c0_4, %c0_5] : memref<16x1xf32, #tpu.memory_space<vmem>>, vector<16x1xf32>
    %5 = vector.broadcast %4 : vector<16x1xf32> to vector<16x256xf32>
    %6 = arith.addf %3, %5 : vector<16x256xf32>
    %7 = arith.negf %6 : vector<16x256xf32>
    %8 = math.exp %7 : vector<16x256xf32>
    %cst_6 = arith.constant 1.000000e+00 : f32
    %9 = vector.broadcast %cst_6 : f32 to vector<16x256xf32>
    %10 = arith.addf %9, %8 : vector<16x256xf32>
    %11 = arith.divf %9, %10 : vector<16x256xf32>
    %12 = arith.mulf %6, %11 : vector<16x256xf32>
    %c0_7 = arith.constant 0 : index
    %c0_8 = arith.constant 0 : index
    %13 = vector.load %arg5[%c0_7, %c0_8] : memref<16x16xf32, #tpu.memory_space<vmem>>, vector<16x16xf32>
    %cst_9 = arith.constant dense<0.000000e+00> : vector<16x256xf32>
    %14 = tpu.matmul %13, %1, %cst_9 {dimension_numbers = #tpu.dot_dimension_numbers<[1], [0], [0], [1], [0, 0, 1, 1], [], []>} : vector<16x16xf32>, vector<16x256xf32>, vector<16x256xf32> -> vector<16x256xf32>
    %c0_10 = arith.constant 0 : index
    %c0_11 = arith.constant 0 : index
    %15 = vector.load %arg6[%c0_10, %c0_11] : memref<16x1xf32, #tpu.memory_space<vmem>>, vector<16x1xf32>
    %16 = vector.broadcast %15 : vector<16x1xf32> to vector<16x256xf32>
    %17 = arith.addf %14, %16 : vector<16x256xf32>
    %18 = arith.negf %17 : vector<16x256xf32>
    %19 = math.exp %18 : vector<16x256xf32>
    %cst_12 = arith.constant 1.000000e+00 : f32
    %20 = vector.broadcast %cst_12 : f32 to vector<16x256xf32>
    %21 = arith.addf %20, %19 : vector<16x256xf32>
    %22 = arith.divf %20, %21 : vector<16x256xf32>
    %23 = arith.mulf %17, %22 : vector<16x256xf32>
    %c0_13 = arith.constant 0 : index
    %c0_14 = arith.constant 0 : index
    %24 = vector.load %arg7[%c0_13, %c0_14] : memref<16x16xf32, #tpu.memory_space<vmem>>, vector<16x16xf32>
    %cst_15 = arith.constant dense<0.000000e+00> : vector<16x256xf32>
    %25 = tpu.matmul %24, %12, %cst_15 {dimension_numbers = #tpu.dot_dimension_numbers<[1], [0], [0], [1], [0, 0, 1, 1], [], []>} : vector<16x16xf32>, vector<16x256xf32>, vector<16x256xf32> -> vector<16x256xf32>
    %c0_16 = arith.constant 0 : index
    %c0_17 = arith.constant 0 : index
    %26 = vector.load %arg8[%c0_16, %c0_17] : memref<16x1xf32, #tpu.memory_space<vmem>>, vector<16x1xf32>
    %27 = vector.broadcast %26 : vector<16x1xf32> to vector<16x256xf32>
    %28 = arith.addf %25, %27 : vector<16x256xf32>
    %29 = arith.negf %28 : vector<16x256xf32>
    %30 = math.exp %29 : vector<16x256xf32>
    %cst_18 = arith.constant 1.000000e+00 : f32
    %31 = vector.broadcast %cst_18 : f32 to vector<16x256xf32>
    %32 = arith.addf %31, %30 : vector<16x256xf32>
    %33 = arith.divf %31, %32 : vector<16x256xf32>
    %34 = arith.mulf %28, %33 : vector<16x256xf32>
    %c17_i32 = arith.constant 17 : i32
    %35 = tpu.dynamic_rotate %34 by %c17_i32 dim 1 : vector<16x256xf32>, i32 -> vector<16x256xf32>
    %c0_19 = arith.constant 0 : index
    %c0_20 = arith.constant 0 : index
    %36 = vector.load %arg2[%c0_19, %c0_20] : memref<9x256xf32, #tpu.memory_space<vmem>>, vector<1x256xf32>
    %37 = vector.broadcast %36 : vector<1x256xf32> to vector<16x256xf32>
    %38 = arith.mulf %35, %37 : vector<16x256xf32>
    %c0_21 = arith.constant 0 : index
    %c0_22 = arith.constant 0 : index
    %39 = vector.load %arg15[%c0_21, %c0_22] : memref<144x256xf32, #tpu.memory_space<vmem>>, vector<16x256xf32>
    tpu.vector_store %arg15[%c0_21, %c0_22], %38 {strides = array<i32>} : memref<144x256xf32, #tpu.memory_space<vmem>>, vector<16x256xf32>,
    %c16_i32 = arith.constant 16 : i32
    %40 = tpu.dynamic_rotate %34 by %c16_i32 dim 1 : vector<16x256xf32>, i32 -> vector<16x256xf32>
    %c1 = arith.constant 1 : index
    %c0_23 = arith.constant 0 : index
    %41 = vector.load %arg2[%c1, %c0_23] : memref<9x256xf32, #tpu.memory_space<vmem>>, vector<1x256xf32>
    %42 = vector.broadcast %41 : vector<1x256xf32> to vector<16x256xf32>
    %43 = arith.mulf %40, %42 : vector<16x256xf32>
    %c16 = arith.constant 16 : index
    %c0_24 = arith.constant 0 : index
    %44 = vector.load %arg15[%c16, %c0_24] : memref<144x256xf32, #tpu.memory_space<vmem>>, vector<16x256xf32>
    tpu.vector_store %arg15[%c16, %c0_24], %43 {strides = array<i32>} : memref<144x256xf32, #tpu.memory_space<vmem>>, vector<16x256xf32>,
    %c15_i32 = arith.constant 15 : i32
    %45 = tpu.dynamic_rotate %34 by %c15_i32 dim 1 : vector<16x256xf32>, i32 -> vector<16x256xf32>
    %c2 = arith.constant 2 : index
    %c0_25 = arith.constant 0 : index
    %46 = vector.load %arg2[%c2, %c0_25] : memref<9x256xf32, #tpu.memory_space<vmem>>, vector<1x256xf32>
    %47 = vector.broadcast %46 : vector<1x256xf32> to vector<16x256xf32>
    %48 = arith.mulf %45, %47 : vector<16x256xf32>
    %c32 = arith.constant 32 : index
    %c0_26 = arith.constant 0 : index
    %49 = vector.load %arg15[%c32, %c0_26] : memref<144x256xf32, #tpu.memory_space<vmem>>, vector<16x256xf32>
    tpu.vector_store %arg15[%c32, %c0_26], %48 {strides = array<i32>} : memref<144x256xf32, #tpu.memory_space<vmem>>, vector<16x256xf32>,
    %c1_i32 = arith.constant 1 : i32
    %50 = tpu.dynamic_rotate %34 by %c1_i32 dim 1 : vector<16x256xf32>, i32 -> vector<16x256xf32>
    %c3 = arith.constant 3 : index
    %c0_27 = arith.constant 0 : index
    %51 = vector.load %arg2[%c3, %c0_27] : memref<9x256xf32, #tpu.memory_space<vmem>>, vector<1x256xf32>
    %52 = vector.broadcast %51 : vector<1x256xf32> to vector<16x256xf32>
    %53 = arith.mulf %50, %52 : vector<16x256xf32>
    %c48 = arith.constant 48 : index
    %c0_28 = arith.constant 0 : index
    %54 = vector.load %arg15[%c48, %c0_28] : memref<144x256xf32, #tpu.memory_space<vmem>>, vector<16x256xf32>
    tpu.vector_store %arg15[%c48, %c0_28], %53 {strides = array<i32>} : memref<144x256xf32, #tpu.memory_space<vmem>>, vector<16x256xf32>,
    %c64 = arith.constant 64 : index
    %c0_29 = arith.constant 0 : index
    %55 = vector.load %arg15[%c64, %c0_29] : memref<144x256xf32, #tpu.memory_space<vmem>>, vector<16x256xf32>
    tpu.vector_store %arg15[%c64, %c0_29], %34 {strides = array<i32>} : memref<144x256xf32, #tpu.memory_space<vmem>>, vector<16x256xf32>,
    %c255_i32 = arith.constant 255 : i32
    %56 = tpu.dynamic_rotate %34 by %c255_i32 dim 1 : vector<16x256xf32>, i32 -> vector<16x256xf32>
    %c5 = arith.constant 5 : index
    %c0_30 = arith.constant 0 : index
    %57 = vector.load %arg2[%c5, %c0_30] : memref<9x256xf32, #tpu.memory_space<vmem>>, vector<1x256xf32>
    %58 = vector.broadcast %57 : vector<1x256xf32> to vector<16x256xf32>
    %59 = arith.mulf %56, %58 : vector<16x256xf32>
    %c80 = arith.constant 80 : index
    %c0_31 = arith.constant 0 : index
    %60 = vector.load %arg15[%c80, %c0_31] : memref<144x256xf32, #tpu.memory_space<vmem>>, vector<16x256xf32>
    tpu.vector_store %arg15[%c80, %c0_31], %59 {strides = array<i32>} : memref<144x256xf32, #tpu.memory_space<vmem>>, vector<16x256xf32>,
    %c241_i32 = arith.constant 241 : i32
    %61 = tpu.dynamic_rotate %34 by %c241_i32 dim 1 : vector<16x256xf32>, i32 -> vector<16x256xf32>
    %c6 = arith.constant 6 : index
    %c0_32 = arith.constant 0 : index
    %62 = vector.load %arg2[%c6, %c0_32] : memref<9x256xf32, #tpu.memory_space<vmem>>, vector<1x256xf32>
    %63 = vector.broadcast %62 : vector<1x256xf32> to vector<16x256xf32>
    %64 = arith.mulf %61, %63 : vector<16x256xf32>
    %c96 = arith.constant 96 : index
    %c0_33 = arith.constant 0 : index
    %65 = vector.load %arg15[%c96, %c0_33] : memref<144x256xf32, #tpu.memory_space<vmem>>, vector<16x256xf32>
    tpu.vector_store %arg15[%c96, %c0_33], %64 {strides = array<i32>} : memref<144x256xf32, #tpu.memory_space<vmem>>, vector<16x256xf32>,
    %c240_i32 = arith.constant 240 : i32
    %66 = tpu.dynamic_rotate %34 by %c240_i32 dim 1 : vector<16x256xf32>, i32 -> vector<16x256xf32>
    %c7 = arith.constant 7 : index
    %c0_34 = arith.constant 0 : index
    %67 = vector.load %arg2[%c7, %c0_34] : memref<9x256xf32, #tpu.memory_space<vmem>>, vector<1x256xf32>
    %68 = vector.broadcast %67 : vector<1x256xf32> to vector<16x256xf32>
    %69 = arith.mulf %66, %68 : vector<16x256xf32>
    %c112 = arith.constant 112 : index
    %c0_35 = arith.constant 0 : index
    %70 = vector.load %arg15[%c112, %c0_35] : memref<144x256xf32, #tpu.memory_space<vmem>>, vector<16x256xf32>
    tpu.vector_store %arg15[%c112, %c0_35], %69 {strides = array<i32>} : memref<144x256xf32, #tpu.memory_space<vmem>>, vector<16x256xf32>,
    %c239_i32 = arith.constant 239 : i32
    %71 = tpu.dynamic_rotate %34 by %c239_i32 dim 1 : vector<16x256xf32>, i32 -> vector<16x256xf32>
    %c8 = arith.constant 8 : index
    %c0_36 = arith.constant 0 : index
    %72 = vector.load %arg2[%c8, %c0_36] : memref<9x256xf32, #tpu.memory_space<vmem>>, vector<1x256xf32>
    %73 = vector.broadcast %72 : vector<1x256xf32> to vector<16x256xf32>
    %74 = arith.mulf %71, %73 : vector<16x256xf32>
    %c128 = arith.constant 128 : index
    %c0_37 = arith.constant 0 : index
    %75 = vector.load %arg15[%c128, %c0_37] : memref<144x256xf32, #tpu.memory_space<vmem>>, vector<16x256xf32>
    tpu.vector_store %arg15[%c128, %c0_37], %74 {strides = array<i32>} : memref<144x256xf32, #tpu.memory_space<vmem>>, vector<16x256xf32>,
    %c0_38 = arith.constant 0 : index
    %c0_39 = arith.constant 0 : index
    %76 = vector.load %arg9[%c0_38, %c0_39] : memref<16x144xf32, #tpu.memory_space<vmem>>, vector<16x144xf32>
    %c0_40 = arith.constant 0 : index
    %c0_41 = arith.constant 0 : index
    %77 = vector.load %arg15[%c0_40, %c0_41] : memref<144x256xf32, #tpu.memory_space<vmem>>, vector<144x256xf32>
    %cst_42 = arith.constant dense<0.000000e+00> : vector<16x256xf32>
    %78 = tpu.matmul %76, %77, %cst_42 {dimension_numbers = #tpu.dot_dimension_numbers<[1], [0], [0], [1], [0, 0, 1, 1], [], []>} : vector<16x144xf32>, vector<144x256xf32>, vector<16x256xf32> -> vector<16x256xf32>
    %c0_43 = arith.constant 0 : index
    %c0_44 = arith.constant 0 : index
    %79 = vector.load %arg10[%c0_43, %c0_44] : memref<16x1xf32, #tpu.memory_space<vmem>>, vector<16x1xf32>
    %80 = vector.broadcast %79 : vector<16x1xf32> to vector<16x256xf32>
    %81 = arith.addf %78, %80 : vector<16x256xf32>
    %82 = arith.negf %81 : vector<16x256xf32>
    %83 = math.exp %82 : vector<16x256xf32>
    %cst_45 = arith.constant 1.000000e+00 : f32
    %84 = vector.broadcast %cst_45 : f32 to vector<16x256xf32>
    %85 = arith.addf %84, %83 : vector<16x256xf32>
    %86 = arith.divf %84, %85 : vector<16x256xf32>
    %87 = arith.mulf %81, %86 : vector<16x256xf32>
    %88 = arith.addf %12, %87 : vector<16x256xf32>
    %c0_46 = arith.constant 0 : index
    %c0_47 = arith.constant 0 : index
    %89 = vector.load %arg11[%c0_46, %c0_47] : memref<32x16xf32, #tpu.memory_space<vmem>>, vector<32x16xf32>
    %cst_48 = arith.constant dense<0.000000e+00> : vector<32x256xf32>
    %90 = tpu.matmul %89, %88, %cst_48 {dimension_numbers = #tpu.dot_dimension_numbers<[1], [0], [0], [1], [0, 0, 1, 1], [], []>} : vector<32x16xf32>, vector<16x256xf32>, vector<32x256xf32> -> vector<32x256xf32>
    %c0_49 = arith.constant 0 : index
    %c0_50 = arith.constant 0 : index
    %91 = vector.load %arg12[%c0_49, %c0_50] : memref<32x16xf32, #tpu.memory_space<vmem>>, vector<32x16xf32>
    %cst_51 = arith.constant dense<0.000000e+00> : vector<32x256xf32>
    %92 = tpu.matmul %91, %23, %cst_51 {dimension_numbers = #tpu.dot_dimension_numbers<[1], [0], [0], [1], [0, 0, 1, 1], [], []>} : vector<32x16xf32>, vector<16x256xf32>, vector<32x256xf32> -> vector<32x256xf32>
    %93 = arith.addf %90, %92 : vector<32x256xf32>
    %c0_52 = arith.constant 0 : index
    %c0_53 = arith.constant 0 : index
    %94 = vector.load %arg13[%c0_52, %c0_53] : memref<32x1xf32, #tpu.memory_space<vmem>>, vector<32x1xf32>
    %95 = vector.broadcast %94 : vector<32x1xf32> to vector<32x256xf32>
    %96 = arith.addf %93, %95 : vector<32x256xf32>
    %97 = arith.negf %96 : vector<32x256xf32>
    %98 = math.exp %97 : vector<32x256xf32>
    %cst_54 = arith.constant 1.000000e+00 : f32
    %99 = vector.broadcast %cst_54 : f32 to vector<32x256xf32>
    %100 = arith.addf %99, %98 : vector<32x256xf32>
    %101 = arith.divf %99, %100 : vector<32x256xf32>
    %102 = arith.mulf %96, %101 : vector<32x256xf32>
    %c0_55 = arith.constant 0 : index
    %c0_56 = arith.constant 0 : index
    %c0_57 = arith.constant 0 : index
    %103 = vector.load %arg14[%c0_55, %c0_56, %c0_57] : memref<1x32x256xf32, #tpu.memory_space<vmem>>, vector<1x32x256xf32>
    %104 = vector.shape_cast %103 : vector<1x32x256xf32> to vector<32x256xf32>
    %105 = vector.shape_cast %102 : vector<32x256xf32> to vector<1x32x256xf32>
    tpu.vector_store %arg14[%c0_55, %c0_56, %c0_57], %105 {strides = array<i32>} : memref<1x32x256xf32, #tpu.memory_space<vmem>>, vector<1x32x256xf32>,
    return
  }
  func.func @transform_0(%arg0: i32) -> (i32, i32, i32) {
    %c0_i32 = arith.constant 0 : i32
    %c0_i32_0 = arith.constant 0 : i32
    %c0_i32_1 = arith.constant 0 : i32
    return %arg0, %c0_i32, %c0_i32_0 : i32, i32, i32
  }
  func.func @transform_1(%arg0: i32) -> (i32, i32) {
    %c0_i32 = arith.constant 0 : i32
    %c0_i32_0 = arith.constant 0 : i32
    %c0_i32_1 = arith.constant 0 : i32
    return %c0_i32, %c0_i32_0 : i32, i32
  }
  func.func @transform_2(%arg0: i32) -> (i32, i32) {
    %c0_i32 = arith.constant 0 : i32
    %c0_i32_0 = arith.constant 0 : i32
    %c0_i32_1 = arith.constant 0 : i32
    return %c0_i32, %c0_i32_0 : i32, i32
  }
  func.func @transform_3(%arg0: i32) -> (i32, i32) {
    %c0_i32 = arith.constant 0 : i32
    %c0_i32_0 = arith.constant 0 : i32
    %c0_i32_1 = arith.constant 0 : i32
    return %c0_i32, %c0_i32_0 : i32, i32
  }
  func.func @transform_4(%arg0: i32) -> (i32, i32) {
    %c0_i32 = arith.constant 0 : i32
    %c0_i32_0 = arith.constant 0 : i32
    %c0_i32_1 = arith.constant 0 : i32
    return %c0_i32, %c0_i32_0 : i32, i32
  }
  func.func @transform_5(%arg0: i32) -> (i32, i32) {
    %c0_i32 = arith.constant 0 : i32
    %c0_i32_0 = arith.constant 0 : i32
    %c0_i32_1 = arith.constant 0 : i32
    return %c0_i32, %c0_i32_0 : i32, i32
  }
  func.func @transform_6(%arg0: i32) -> (i32, i32) {
    %c0_i32 = arith.constant 0 : i32
    %c0_i32_0 = arith.constant 0 : i32
    %c0_i32_1 = arith.constant 0 : i32
    return %c0_i32, %c0_i32_0 : i32, i32
  }
  func.func @transform_7(%arg0: i32) -> (i32, i32) {
    %c0_i32 = arith.constant 0 : i32
    %c0_i32_0 = arith.constant 0 : i32
    %c0_i32_1 = arith.constant 0 : i32
    return %c0_i32, %c0_i32_0 : i32, i32
  }
  func.func @transform_8(%arg0: i32) -> (i32, i32) {
    %c0_i32 = arith.constant 0 : i32
    %c0_i32_0 = arith.constant 0 : i32
    %c0_i32_1 = arith.constant 0 : i32
    return %c0_i32, %c0_i32_0 : i32, i32
  }
  func.func @transform_9(%arg0: i32) -> (i32, i32) {
    %c0_i32 = arith.constant 0 : i32
    %c0_i32_0 = arith.constant 0 : i32
    %c0_i32_1 = arith.constant 0 : i32
    return %c0_i32, %c0_i32_0 : i32, i32
  }
  func.func @transform_10(%arg0: i32) -> (i32, i32) {
    %c0_i32 = arith.constant 0 : i32
    %c0_i32_0 = arith.constant 0 : i32
    %c0_i32_1 = arith.constant 0 : i32
    return %c0_i32, %c0_i32_0 : i32, i32
  }
  func.func @transform_11(%arg0: i32) -> (i32, i32) {
    %c0_i32 = arith.constant 0 : i32
    %c0_i32_0 = arith.constant 0 : i32
    %c0_i32_1 = arith.constant 0 : i32
    return %c0_i32, %c0_i32_0 : i32, i32
  }
  func.func @transform_12(%arg0: i32) -> (i32, i32) {
    %c0_i32 = arith.constant 0 : i32
    %c0_i32_0 = arith.constant 0 : i32
    %c0_i32_1 = arith.constant 0 : i32
    return %c0_i32, %c0_i32_0 : i32, i32
  }
  func.func @transform_13(%arg0: i32) -> (i32, i32, i32) {
    %c0_i32 = arith.constant 0 : i32
    %c0_i32_0 = arith.constant 0 : i32
    %c0_i32_1 = arith.constant 0 : i32
    return %arg0, %c0_i32, %c0_i32_0 : i32, i32, i32
  }
}

</mosaic_0001>

<bundles_post_ra>
// kernel: c3_forward.1
= control target key start
LH: loop header
LB: loop body
LE: loop exit
PB: predicated region body
PF: predicated region fallthrough
CT: control target
= control target key end

     0   :  { %s1954_s25 = smov 0   ;;  %s2315_s0 = inlined_call_operand.vmem [shape: f32[2,16,256], index: 0, kind: input, shape index: {}]   ;;  %s2316_s1 = inlined_call_operand.vmem [shape: f32[9,256], index: 1, kind: input, shape index: {}]   ;;  %s2317_s2 = inlined_call_operand.vmem [shape: f32[16,16], index: 2, kind: input, shape index: {}]   ;;  %s2318_s3 = inlined_call_operand.vmem [shape: f32[16,1], index: 3, kind: input, shape index: {}]   ;;  %s2319_s4 = inlined_call_operand.vmem [shape: f32[16,16], index: 4, kind: input, shape index: {}]   ;;  %s2320_s5 = inlined_call_operand.vmem [shape: f32[16,1], index: 5, kind: input, shape index: {}]   ;;  %s2321_s6 = inlined_call_operand.vmem [shape: f32[16,16], index: 6, kind: input, shape index: {}]   ;;  %s2322_s7 = inlined_call_operand.vmem [shape: f32[16,1], index: 7, kind: input, shape index: {}]   ;;  %s2323_s8 = inlined_call_operand.vmem [shape: f32[16,144], index: 8, kind: input, shape index: {}]   ;;  %s2324_s9 = inlined_call_operand.vmem [shape: f32[16,1], index: 9, kind: input, shape index: {}]   ;;  %s2325_s10 = inlined_call_operand.vmem [shape: f32[32,16], index: 10, kind: input, shape index: {}]   ;;  %s2326_s11 = inlined_call_operand.vmem [shape: f32[32,16], index: 11, kind: input, shape index: {}]   ;;  %s2327_s12 = inlined_call_operand.vmem [shape: f32[32,1], index: 12, kind: input, shape index: {}]   ;;  %s2328_s13 = inlined_call_operand.vmem [shape: f32[2,32,256], index: 13, kind: output, shape index: {}]  }
   0x1 LB: > { %s1626_s26 = sadd.s32 4294967295, %s1872_s25   ;;  %p1630_p0 = scmp.ge.s32.totalorder %s1872_s25, 1  ;;  %s1872_s25 = sphi %s1954_s25, %s23_s25  }
   0x2   : > { %p387_p1 = scmp.lt.s32.totalorder %s1872_s25, 3 }
   0x4   : > { %p388_p2 = pnand %p1630_p0, %p387_p1 }
   0x5   : > { %p431_p3 = scmp.lt.s32.totalorder (!%p388_p2), %s1626_s26, 1  ;;  %v1874_v0 = vmov (!%p388_p2), 0.0   ;;  %v1875_v1 = vmov (!%p388_p2), 0   ;;  %v447_v2 = vld [vmem:[%s2318_s3] sm:$0xff] (!%p388_p2)  ;;  %v448_v3 = vld [vmem:[%s2318_s3 + $0x8] sm:$0xff] (!%p388_p2)  ;;  %vm459_vm0 = vcmask (!%p388_p2), 130048  }
   0x6   : > { %391 = sbr.rel (%p388_p2) target bundleno = 1219 (0x4c3), region = 72  ;;  %530 = vmatprep.mubr.f32.mxu0 (!%p388_p2), %v1874_v0  ;;  %1768 = vset.pattern.permute.xlu0 (!%p388_p2), %v1875_v1  ;;  %v445_v10 = vld [vmem:[%s2317_s2] sm:$0xff] (!%p388_p2)  ;;  %v446_v11 = vld [vmem:[%s2317_s2 + $0x8] sm:$0xff] (!%p388_p2)  ;;  %s1876_s19 = smov (!%p388_p2), 17  }
   0x7   : > { %451 = vperm.xlu0 (!%p388_p2), %1768, %v447_v2   ;;  %1769 = vset.pattern.permute.xlu1 (!%p388_p2), %v1875_v1  ;;  %v698_v12 = vld [vmem:[%s2322_s7] sm:$0xff] (!%p388_p2)  ;;  %v699_v13 = vld [vmem:[%s2322_s7 + $0x8] sm:$0xff] (!%p388_p2)  ;;  %s1877_s20 = smov (!%p388_p2), 16   ;;  %s1878_s21 = smov (!%p388_p2), 15  }
   0x8   : > { %655 = vmatprep.mubr.f32.mxu1 (!%p388_p2), %v1874_v0  ;;  %702 = vperm.xlu1 (!%p388_p2), %1769, %v698_v12   ;;  %v696_v46 = vld [vmem:[%s2321_s6] sm:$0xff] (!%p388_p2)  ;;  %v697_v47 = vld [vmem:[%s2321_s6 + $0x8] sm:$0xff] (!%p388_p2)  ;;  %s1879_s22 = smov (!%p388_p2), 1   ;;  %s1880_s23 = smov (!%p388_p2), 127  }
   0x9   : > { %v571_v48 = vld [vmem:[%s2319_s4] sm:$0xff] (!%p388_p2)  ;;  %v572_v49 = vld [vmem:[%s2319_s4 + $0x8] sm:$0xff] (!%p388_p2)  ;;  %s1881_s24 = smov (!%p388_p2), 113   ;;  %s1882_s27 = smov (!%p388_p2), 112  }
   0xa   : > { %s1883_s28 = smov (!%p388_p2), 111  }
   0xb   : > { %456 = vperm.xlu0 (!%p388_p2), %1768, %v448_v3  }
   0xc   : > { %707 = vperm.xlu1 (!%p388_p2), %1769, %v699_v13  }
   0xd   : > { %s2330_s26 = smov (!%p431_p3, %s1626_s26), 1 }
   0xe   : > { %s1684_s14 = sshll.u32 %s2330_s26, 5 }
   0xf   : > { %s435_s17 = scalar_lea.vmem %s2315_s0, %s1684_s14 }
  0x10   : > { %v442_v4 = vld [vmem:[%s435_s17 + $0x8] sm:$0xff]  ;;  %v444_v5 = vld [vmem:[%s435_s17 + $0x18] sm:$0xff]  ;;  %v441_v6 = vld [vmem:[%s435_s17] sm:$0xff] }
  0x11   : > { %v1686_v7 = vpack.c.bf16 %v444_v5, %v442_v4  ;;  %v443_v8 = vld [vmem:[%s435_s17 + $0x10] sm:$0xff] }
  0x12   : > { %v1688_v9 = vpack.c.bf16 %v443_v8, %v441_v6 }
  0x13   : > { %1687 = vmatprep.subr.bf16.mxu0 %v1686_v7  ;;  %1691 = vmatprep.subr.bf16.mxu1 %v1686_v7 }
  0x14   : > { %1689 = vmatpush1.bf16.msra.mxu0 %v1688_v9  ;;  %1693 = vmatpush1.bf16.msra.mxu1 %v1688_v9 }
  0x17   : > { %1635 = vmatmul.mubr.msk.f32.vlgmr.msra.gmra.mrb[0].mxu0 %vm459_vm0, %v445_v10  ;;  %1641 = vmatmul.mubr.msk.f32.vlgmr.msra.gmra.mrb[0].mxu1 %vm459_vm0, %v571_v48 }
  0x18   : > { %536 = vmatprep.mubr.f32.mxu0 %v1874_v0  ;;  %661 = vmatprep.mubr.f32.mxu1 %v1874_v0 }
  0x1b   : > { %1636 = vmatmul.mubr.msk.f32.gmra.mrb[2].mxu0 %vm459_vm0, %v446_v11  ;;  %1642 = vmatmul.mubr.msk.f32.gmra.mrb[2].mxu1 %vm459_vm0, %v572_v49 }
  0x1c   : > { %780 = vmatprep.mubr.f32.mxu0 %v1874_v0 }
  0x86   : > { %v452_v14 = vpop.permute.xlu0 %451 }
  0x87   : > { %v703_v50 = vpop.permute.xlu1 %702 }
  0x8a   : > { %v457_v20 = vpop.permute.xlu0 %456 }
  0x8b   : > { %v708_v56 = vpop.permute.xlu1 %707 }
  0xea   : > { %v532_v15 = vpop.f32.mrb[0].mxu0 }
  0xeb   : > { %v533_v16 = vadd.f32 %v532_v15, %v452_v14  ;;  %v534_v17 = vpop.f32.mrb[1].mxu0 }
  0xec   : > { %v535_v18 = vadd.f32 %v534_v17, %v452_v14 }
  0xed   : > { %v1637_v19 = vmul.f32 -1.442695, %v533_v16 }
  0xee   : > { %v1638_v21 = vmul.f32 -1.442695, %v535_v18  ;;  %v538_v22 = vpop.f32.mrb[2].mxu0 }
  0xef   : > { %1770 = vpow2.f32 %v1637_v19  ;;  %v539_v23 = vadd.f32 %v538_v22, %v457_v20  ;;  %v540_v24 = vpop.f32.mrb[3].mxu0  ;;  %v1099_v19 = vld [vmem:[%s2323_s8 + $0x8] sm:$0xff] }
  0xf0   : > { %1772 = vpow2.f32 %v1638_v21  ;;  %v541_v25 = vadd.f32 %v540_v24, %v457_v20  ;;  %1660 = vmatprep.mubr.msk.f32.mxu1 %vm459_vm0, %v1099_v19  ;;  %v573_v20 = vld [vmem:[%s2320_s5] sm:$0xff]  ;;  %v2073_v21 = vpop.f32.mrb[0].mxu1 }
  0xf1   : > { %v1639_v26 = vmul.f32 -1.442695, %v539_v23  ;;  %v2075_v22 = vpop.f32.mrb[1].mxu1  ;;  %v1138_v24 = vld [vmem:[%s2324_s9] sm:$0xff] }
  0xf2   : > { %v1640_v27 = vmul.f32 -1.442695, %v541_v25 }
  0xf3   : > { %1774 = vpow2.f32 %v1639_v26 }
  0xf4   : > { %1776 = vpow2.f32 %v1640_v27  ;;  %v1139_v27 = vld [vmem:[%s2324_s9 + $0x8] sm:$0xff] }
  0xf9   : > { %v1771_v28 = vpop.eup %1770 }
  0xfa   : > { %v1773_v29 = vpop.eup %1772  ;;  %v555_v30 = vadd.f32 1.0, %v1771_v28  ;;  %v1475_v28 = vld [vmem:[%s2327_s12] sm:$0xff] }
  0xfb   : > { %v556_v31 = vadd.f32 1.0, %v1773_v29  ;;  %v1476_v29 = vld [vmem:[%s2327_s12 + $0x8] sm:$0xff] }
  0xfc   : > { %1778 = vrcp.f32 %v555_v30  ;;  %v1477_v30 = vld [vmem:[%s2327_s12 + $0x10] sm:$0xff] }
  0xfd   : > { %v1775_v32 = vpop.eup %1774  ;;  %1780 = vrcp.f32 %v556_v31  ;;  %v1478_v31 = vld [vmem:[%s2327_s12 + $0x18] sm:$0xff] }
  0xfe   : > { %v1777_v33 = vpop.eup %1776  ;;  %v557_v34 = vadd.f32 1.0, %v1775_v32 }
  0xff   : > { %v558_v35 = vadd.f32 1.0, %v1777_v33 }
 0x100   : > { %1782 = vrcp.f32 %v557_v34 }
 0x101   : > { %1784 = vrcp.f32 %v558_v35 }
 0x106   : > { %v1779_v36 = vpop.eup %1778 }
 0x107   : > { %v1781_v37 = vpop.eup %1780  ;;  %v1998_v43 = vmul.f32 %v1779_v36, %v533_v16 }
 0x108   : > { %v1994_v41 = vmul.f32 %v1781_v37, %v535_v18 }
 0x10a   : > { %v1783_v38 = vpop.eup %1782 }
 0x10b   : > { %v1785_v39 = vpop.eup %1784  ;;  %v1992_v40 = vmul.f32 %v1783_v38, %v539_v23  ;;  %v574_v23 = vld [vmem:[%s2320_s5 + $0x8] sm:$0xff] }
 0x10c   : > { %v1996_v42 = vmul.f32 %v1785_v39, %v541_v25  ;;  %v2084_v25 = vpop.f32.mrb[2].mxu1 }
 0x10d   : > { %v1696_v45 = vpack.c.bf16 %v1992_v40, %v1998_v43  ;;  %v2086_v26 = vpop.f32.mrb[3].mxu1 }
 0x10e   : > { %v1694_v44 = vpack.c.bf16 %v1996_v42, %v1994_v41 }
 0x110   : > { %1695 = vmatprep.subr.bf16.mxu0 %v1694_v44 }
 0x111   : > { %1697 = vmatpush1.bf16.msra.mxu0 %v1696_v45  ;;  %v829_v45 = vlaneseq }
 0x113   : > { %v839_v48 = vshrl.u32 %v829_v45, 7 }
 0x114   : > { %1647 = vmatmul.mubr.msk.f32.vlgmr.msra.gmra.mrb[4].mxu0 %vm459_vm0, %v696_v46 }
 0x115   : > { %786 = vmatprep.mubr.f32.mxu0 %v1874_v0 }
 0x118   : > { %1648 = vmatmul.mubr.msk.f32.gmra.mrb[6].mxu0 %vm459_vm0, %v697_v47 }
 0x119   : > { %1349 = vmatprep.mubr.f32.mxu0 %v1874_v0 }
 0x1e7   : > { %v782_v51 = vpop.f32.mrb[4].mxu0 }
 0x1e8   : > { %v783_v52 = vadd.f32 %v782_v51, %v703_v50  ;;  %v784_v53 = vpop.f32.mrb[5].mxu0  ;;  %v2117_v51 = vand.u32 127, %v829_v45 }
 0x1e9   : > { %v785_v54 = vadd.f32 %v784_v53, %v703_v50  ;;  %v2121_v53 = vsub.s32 1, %v839_v48 }
 0x1ea   : > { %v1649_v55 = vmul.f32 -1.442695, %v783_v52  ;;  %vm831_vm1 = vcmp.lt.s32.totalorder %v2117_v51, 17  ;;  %vm864_vm2 = vcmp.lt.s32.totalorder %v2117_v51, 16  ;;  %vm898_vm3 = vcmp.lt.s32.totalorder %v2117_v51, 15 }
 0x1eb   : > { %v1650_v57 = vmul.f32 -1.442695, %v785_v54  ;;  %v788_v58 = vpop.f32.mrb[6].mxu0  ;;  %vm932_vm4 = vcmp.lt.s32.totalorder %v2117_v51, 1  ;;  %vm970_vm5 = vcmp.lt.s32.totalorder %v2117_v51, 127  ;;  %vm1004_vm6 = vcmp.lt.s32.totalorder %v2117_v51, 113 }
 0x1ec   : > { %1786 = vpow2.f32 %v1649_v55  ;;  %v789_v59 = vadd.f32 %v788_v58, %v708_v56  ;;  %v790_v60 = vpop.f32.mrb[7].mxu0  ;;  %vm1038_vm7 = vcmp.lt.s32.totalorder %v2117_v51, 112  ;;  %vm1072_vm8 = vcmp.lt.s32.totalorder %v2117_v51, 111  ;;  %v1100_v51 = vld [vmem:[%s2323_s8 + $0x10] sm:$0xff] }
 0x1ed   : > { %1788 = vpow2.f32 %v1650_v57  ;;  %v791_v61 = vadd.f32 %v790_v60, %v708_v56 }
 0x1ee   : > { %v1651_v62 = vmul.f32 -1.442695, %v789_v59 }
 0x1ef   : > { %v1652_v63 = vmul.f32 -1.442695, %v791_v61 }
 0x1f0   : > { %1790 = vpow2.f32 %v1651_v62 }
 0x1f1   : > { %1792 = vpow2.f32 %v1652_v63 }
 0x1f6   : > { %v1787_v1 = vpop.eup %1786 }
 0x1f7   : > { %v1789_v2 = vpop.eup %1788  ;;  %v805_v3 = vadd.f32 1.0, %v1787_v1 }
 0x1f8   : > { %v806_v4 = vadd.f32 1.0, %v1789_v2 }
 0x1f9   : > { %1794 = vrcp.f32 %v805_v3 }
 0x1fa   : > { %v1791_v5 = vpop.eup %1790  ;;  %1796 = vrcp.f32 %v806_v4 }
 0x1fb   : > { %v1793_v6 = vpop.eup %1792  ;;  %v807_v7 = vadd.f32 1.0, %v1791_v5 }
 0x1fc   : > { %v808_v8 = vadd.f32 1.0, %v1793_v6 }
 0x1fd   : > { %1798 = vrcp.f32 %v807_v7 }
 0x1fe   : > { %1800 = vrcp.f32 %v808_v8 }
 0x203   : > { %v1795_v9 = vpop.eup %1794 }
 0x204   : > { %v2023_v10 = vmul.f32 %v1795_v9, %v783_v52  ;;  %v1797_v11 = vpop.eup %1796  ;;  %v2119_v52 = vsub.s32 0, %v839_v48  ;;  %v1654_v9 = vld [vmem:[%s2316_s1 + $0x2] ss:$8 sm:$0x3] }
 0x205   : > { %v2028_v15 = vmul.f32 %v1797_v11, %v785_v54  ;;  %v836_v54 = vld [vmem:[%s2316_s1] ss:$8 sm:$0x3] }
 0x206   : > { %821 = vrot.lane.b32.xlu0 %v2023_v10, %s1876_s19  ;;  %v841_v57 = vrot.slane %v836_v54, %v2119_v52  ;;  %v845_v58 = vrot.slane %v836_v54, %v2121_v53 }
 0x207   : > { %v1799_v12 = vpop.eup %1798 }
 0x208   : > { %v1801_v13 = vpop.eup %1800  ;;  %v2026_v14 = vmul.f32 %v1799_v12, %v789_v59  ;;  %v1653_v59 = vld [vmem:[%s2316_s1 + $0x1] ss:$8 sm:$0x3] }
 0x209   : > { %v2030_v16 = vmul.f32 %v1801_v13, %v791_v61  ;;  %v875_v3 = vrot.slane %v1653_v59, %v2119_v52  ;;  %v879_v4 = vrot.slane %v1653_v59, %v2121_v53 }
 0x20a   : > { %823 = vrot.lane.b32.xlu1 %v2026_v14, %s1876_s19  ;;  %856 = vrot.lane.b32.xlu0 %v2023_v10, %s1877_s20  ;;  %v1716_v17 = vpack.c.bf16 %v2026_v14, %v2023_v10 }
 0x20b   : > { %v1714_v18 = vpack.c.bf16 %v2030_v16, %v2028_v15 }
 0x20e   : > { %858 = vrot.lane.b32.xlu1 %v2026_v14, %s1877_s20  ;;  %890 = vrot.lane.b32.xlu0 %v2023_v10, %s1878_s21 }
 0x212   : > { %892 = vrot.lane.b32.xlu1 %v2026_v14, %s1878_s21  ;;  %924 = vrot.lane.b32.xlu0 %v2023_v10, %s1879_s22 }
 0x216   : > { %926 = vrot.lane.b32.xlu1 %v2026_v14, %s1879_s22  ;;  %962 = vrot.lane.b32.xlu0 %v2023_v10, %s1880_s23 }
 0x21a   : > { %964 = vrot.lane.b32.xlu1 %v2026_v14, %s1880_s23  ;;  %996 = vrot.lane.b32.xlu0 %v2023_v10, %s1881_s24 }
 0x21e   : > { %998 = vrot.lane.b32.xlu1 %v2026_v14, %s1881_s24  ;;  %1030 = vrot.lane.b32.xlu0 %v2023_v10, %s1882_s27 }
 0x222   : > { %1032 = vrot.lane.b32.xlu1 %v2026_v14, %s1882_s27  ;;  %825 = vrot.lane.b32.xlu0 %v2028_v15, %s1876_s19 }
 0x226   : > { %827 = vrot.lane.b32.xlu1 %v2030_v16, %s1876_s19  ;;  %860 = vrot.lane.b32.xlu0 %v2028_v15, %s1877_s20 }
 0x22a   : > { %862 = vrot.lane.b32.xlu1 %v2030_v16, %s1877_s20  ;;  %894 = vrot.lane.b32.xlu0 %v2028_v15, %s1878_s21 }
 0x22e   : > { %896 = vrot.lane.b32.xlu1 %v2030_v16, %s1878_s21  ;;  %928 = vrot.lane.b32.xlu0 %v2028_v15, %s1879_s22 }
 0x232   : > { %930 = vrot.lane.b32.xlu1 %v2030_v16, %s1879_s22  ;;  %1064 = vrot.lane.b32.xlu0 %v2023_v10, %s1883_s28 }
 0x236   : > { %1066 = vrot.lane.b32.xlu1 %v2026_v14, %s1883_s28  ;;  %966 = vrot.lane.b32.xlu0 %v2028_v15, %s1880_s23 }
 0x23a   : > { %968 = vrot.lane.b32.xlu1 %v2030_v16, %s1880_s23  ;;  %1000 = vrot.lane.b32.xlu0 %v2028_v15, %s1881_s24  ;;  %s1685_s23 = sshll.u32 %s2330_s26, 6 }
 0x23e   : > { %1002 = vrot.lane.b32.xlu1 %v2030_v16, %s1881_s24  ;;  %1034 = vrot.lane.b32.xlu0 %v2028_v15, %s1882_s27 }
 0x242   : > { %1036 = vrot.lane.b32.xlu1 %v2030_v16, %s1882_s27  ;;  %1068 = vrot.lane.b32.xlu0 %v2028_v15, %s1883_s28  ;;  %v1658_v15 = vld [vmem:[%s2316_s1 + $0x7] ss:$8 sm:$0x3] }
 0x246   : > { %1070 = vrot.lane.b32.xlu1 %v2030_v16, %s1883_s28  ;;  %577 = vperm.xlu0 %1768, %v573_v20   ;;  %s440_s28 = scalar_lea.vmem %s2328_s13, %s1685_s23 }
 0x24a   : > { %582 = vperm.xlu1 %1769, %v574_v23   ;;  %1142 = vperm.xlu0 %1768, %v1138_v24  }
 0x24e   : > { %1147 = vperm.xlu1 %1769, %v1139_v27   ;;  %1481 = vperm.xlu0 %1768, %v1475_v28   ;;  %v909_v28 = vrot.slane %v1654_v9, %v2119_v52 }
 0x252   : > { %1486 = vperm.xlu1 %1769, %v1476_v29   ;;  %1491 = vperm.xlu0 %1768, %v1477_v30   ;;  %v913_v29 = vrot.slane %v1654_v9, %v2121_v53 }
 0x256   : > { %1496 = vperm.xlu1 %1769, %v1478_v31  }
 0x278   : > { %v822_v32 = vpop.permute.xlu0 %821 }
 0x27c   : > { %v824_v33 = vpop.permute.xlu1 %823  ;;  %v857_v34 = vpop.permute.xlu0 %856 }
 0x280   : > { %v859_v35 = vpop.permute.xlu1 %858  ;;  %v891_v36 = vpop.permute.xlu0 %890 }
 0x284   : > { %v893_v37 = vpop.permute.xlu1 %892  ;;  %v2103_v38 = vpop.permute.xlu0 %924 }
 0x288   : > { %v2105_v39 = vpop.permute.xlu1 %926  ;;  %v2107_v44 = vpop.permute.xlu0 %962 }
 0x28c   : > { %v2109_v46 = vpop.permute.xlu1 %964  ;;  %v2111_v47 = vpop.permute.xlu0 %996 }
 0x290   : > { %v2113_v49 = vpop.permute.xlu1 %998  ;;  %v2115_v50 = vpop.permute.xlu0 %1030 }
 0x294   : > { %v2126_v55 = vpop.permute.xlu1 %1032  ;;  %v826_v56 = vpop.permute.xlu0 %825 }
 0x295   : > { %v832_v60 = vsel %vm831_vm1, %v822_v32, %v826_v56  ;;  %v834_v61 = vsel %vm831_vm1, %v826_v56, %v822_v32 }
 0x296   : > { %v848_v5 = vmul.f32 %v841_v57, %v834_v61  ;;  %v849_v6 = vmul.f32 %v845_v58, %v832_v60 }
 0x298   : > { %v828_v62 = vpop.permute.xlu1 %827  ;;  %v861_v63 = vpop.permute.xlu0 %860 }
 0x299   : > { %v833_v1 = vsel %vm831_vm1, %v824_v33, %v828_v62  ;;  %v835_v2 = vsel %vm831_vm1, %v828_v62, %v824_v33  ;;  %v865_v11 = vsel %vm864_vm2, %v857_v34, %v861_v63  ;;  %v867_v12 = vsel %vm864_vm2, %v861_v63, %v857_v34  ;;  %v1655_v34 = vld [vmem:[%s2316_s1 + $0x3] ss:$8 sm:$0x3] }
 0x29a   : > { %v850_v7 = vmul.f32 %v841_v57, %v835_v2  ;;  %v851_v8 = vmul.f32 %v845_v58, %v833_v1  ;;  %v882_v30 = vmul.f32 %v875_v3, %v867_v12  ;;  %v883_v31 = vmul.f32 %v879_v4, %v865_v11 }
 0x29b   : > { %v943_v60 = vrot.slane %v1655_v34, %v2119_v52  ;;  %v947_v61 = vrot.slane %v1655_v34, %v2121_v53 }
 0x29c   : > { %v1700_v13 = vpack.c.bf16 %v850_v7, %v848_v5  ;;  %v863_v19 = vpop.permute.xlu1 %862  ;;  %v895_v20 = vpop.permute.xlu0 %894  ;;  %v1698_v23 = vpack.c.bf16 %v851_v8, %v849_v6 }
 0x29d   : > { %v866_v24 = vsel %vm864_vm2, %v859_v35, %v863_v19  ;;  %v868_v27 = vsel %vm864_vm2, %v863_v19, %v859_v35  ;;  %v899_v45 = vsel %vm898_vm3, %v891_v36, %v895_v20  ;;  %v901_v48 = vsel %vm898_vm3, %v895_v20, %v891_v36 }
 0x29e   : > { %v884_v32 = vmul.f32 %v875_v3, %v868_v27  ;;  %v885_v33 = vmul.f32 %v879_v4, %v866_v24  ;;  %1699 = vmatprep.subr.bf16.mxu1 %v1698_v23  ;;  %v916_v62 = vmul.f32 %v909_v28, %v901_v48  ;;  %v917_v63 = vmul.f32 %v913_v29, %v899_v45 }
 0x29f   : > { %1701 = vmatpush1.bf16.msra.mxu1 %v1700_v13 }
 0x2a0   : > { %v1704_v35 = vpack.c.bf16 %v884_v32, %v882_v30  ;;  %v897_v54 = vpop.permute.xlu1 %896  ;;  %v929_v56 = vpop.permute.xlu0 %928  ;;  %v1702_v57 = vpack.c.bf16 %v885_v33, %v883_v31 }
 0x2a1   : > { %v900_v58 = vsel %vm898_vm3, %v893_v37, %v897_v54  ;;  %v902_v59 = vsel %vm898_vm3, %v897_v54, %v893_v37  ;;  %v933_v2 = vsel %vm932_vm4, %v2103_v38, %v929_v56  ;;  %v935_v3 = vsel %vm932_vm4, %v929_v56, %v2103_v38  ;;  %v1656_v38 = vld [vmem:[%s2316_s1 + $0x5] ss:$8 sm:$0x3] }
 0x2a2   : > { %v918_v36 = vmul.f32 %v909_v28, %v902_v59  ;;  %v919_v1 = vmul.f32 %v913_v29, %v900_v58  ;;  %1703 = vmatprep.subr.bf16.mxu1 %v1702_v57  ;;  %v950_v9 = vmul.f32 %v943_v60, %v935_v3  ;;  %v951_v11 = vmul.f32 %v947_v61, %v933_v2  ;;  %v1657_v28 = vld [vmem:[%s2316_s1 + $0x6] ss:$8 sm:$0x3] }
 0x2a3   : > { %1705 = vmatpush1.bf16.msra.mxu1 %v1704_v35  ;;  %v981_v27 = vrot.slane %v1656_v38, %v2119_v52  ;;  %v1015_v45 = vrot.slane %v1657_v28, %v2119_v52  ;;  %v1019_v48 = vrot.slane %v1657_v28, %v2121_v53 }
 0x2a4   : > { %v1708_v4 = vpack.c.bf16 %v918_v36, %v916_v62  ;;  %v931_v37 = vpop.permute.xlu1 %930  ;;  %v2171_v5 = vpop.permute.xlu0 %1064  ;;  %v1706_v6 = vpack.c.bf16 %v919_v1, %v917_v63  ;;  %v1053_v62 = vrot.slane %v1658_v15, %v2121_v53  ;;  %v1659_v36 = vld [vmem:[%s2316_s1 + $0x10] ss:$8 sm:$0x3] }
 0x2a5   : > { %v934_v7 = vsel %vm932_vm4, %v2105_v39, %v931_v37  ;;  %v936_v8 = vsel %vm932_vm4, %v931_v37, %v2105_v39  ;;  %v985_v39 = vrot.slane %v1656_v38, %v2121_v53 }
 0x2a6   : > { %v952_v12 = vmul.f32 %v943_v60, %v936_v8  ;;  %v953_v13 = vmul.f32 %v947_v61, %v934_v7  ;;  %1707 = vmatprep.subr.bf16.mxu1 %v1706_v6  ;;  %v1083_v8 = vrot.slane %v1659_v36, %v2119_v52 }
 0x2a7   : > { %1709 = vmatpush1.bf16.msra.mxu1 %v1708_v4 }
 0x2a8   : > { %v1712_v19 = vpack.c.bf16 %v952_v12, %v950_v9  ;;  %v2182_v20 = vpop.permute.xlu1 %1066  ;;  %v967_v23 = vpop.permute.xlu0 %966  ;;  %v1710_v24 = vpack.c.bf16 %v953_v13, %v951_v11  ;;  %v1087_v9 = vrot.slane %v1659_v36, %v2121_v53  ;;  %v1269_v36 = vld [vmem:[%s2326_s11] sm:$0xff] }
 0x2a9   : > { %v971_v29 = vsel %vm970_vm5, %v2107_v44, %v967_v23  ;;  %v973_v30 = vsel %vm970_vm5, %v967_v23, %v2107_v44 }
 0x2aa   : > { %1711 = vmatprep.subr.bf16.mxu1 %v1710_v24  ;;  %v988_v35 = vmul.f32 %v981_v27, %v971_v29  ;;  %v989_v54 = vmul.f32 %v985_v39, %v973_v30 }
 0x2ab   : > { %1713 = vmatpush1.bf16.msra.mxu1 %v1712_v19 }
 0x2ac   : > { %v969_v31 = vpop.permute.xlu1 %968  ;;  %1715 = vmatprep.subr.bf16.mxu1 %v1714_v18  ;;  %v1001_v32 = vpop.permute.xlu0 %1000 }
 0x2ad   : > { %v972_v33 = vsel %vm970_vm5, %v2109_v46, %v969_v31  ;;  %v974_v34 = vsel %vm970_vm5, %v969_v31, %v2109_v46  ;;  %v1005_v16 = vsel %vm1004_vm6, %v2111_v47, %v1001_v32  ;;  %v1007_v18 = vsel %vm1004_vm6, %v1001_v32, %v2111_v47  ;;  %v1098_v31 = vld [vmem:[%s2323_s8] sm:$0xff]  ;;  %v1101_v32 = vld [vmem:[%s2323_s8 + $0x18] sm:$0xff] }
 0x2ae   : > { %v990_v44 = vmul.f32 %v981_v27, %v972_v33  ;;  %v991_v56 = vmul.f32 %v985_v39, %v974_v34  ;;  %v1049_v47 = vrot.slane %v1658_v15, %v2119_v52  ;;  %v1022_v10 = vmul.f32 %v1015_v45, %v1005_v16 }
 0x2af   : > { %1717 = vmatpush1.bf16.msra.mxu1 %v1716_v17  ;;  %v1023_v14 = vmul.f32 %v1019_v48, %v1007_v18 }
 0x2b0   : > { %v1720_v46 = vpack.c.bf16 %v990_v44, %v988_v35  ;;  %v1003_v57 = vpop.permute.xlu1 %1002  ;;  %v1035_v58 = vpop.permute.xlu0 %1034  ;;  %v1718_v59 = vpack.c.bf16 %v991_v56, %v989_v54 }
 0x2b1   : > { %v1006_v60 = vsel %vm1004_vm6, %v2113_v49, %v1003_v57  ;;  %v1008_v61 = vsel %vm1004_vm6, %v1003_v57, %v2113_v49  ;;  %v1039_v1 = vsel %vm1038_vm7, %v2115_v50, %v1035_v58  ;;  %v1041_v49 = vsel %vm1038_vm7, %v1035_v58, %v2115_v50 }
 0x2b2   : > { %v1024_v17 = vmul.f32 %v1015_v45, %v1006_v60  ;;  %v1025_v63 = vmul.f32 %v1019_v48, %v1008_v61  ;;  %1719 = vmatprep.subr.bf16.mxu1 %v1718_v59  ;;  %v1056_v50 = vmul.f32 %v1049_v47, %v1039_v1  ;;  %v1057_v11 = vmul.f32 %v1053_v62, %v1041_v49  ;;  %v1270_v1 = vld [vmem:[%s2326_s11 + $0x8] sm:$0xff]  ;;  %v1271_v49 = vld [vmem:[%s2326_s11 + $0x10] sm:$0xff] }
 0x2b3   : > { %1721 = vmatpush1.bf16.msra.mxu1 %v1720_v46 }
 0x2b4   : > { %v1724_v2 = vpack.c.bf16 %v1024_v17, %v1022_v10  ;;  %v1037_v3 = vpop.permute.xlu1 %1036  ;;  %v1069_v4 = vpop.permute.xlu0 %1068  ;;  %v1722_v37 = vpack.c.bf16 %v1025_v63, %v1023_v14 }
 0x2b5   : > { %v1040_v6 = vsel %vm1038_vm7, %v2126_v55, %v1037_v3  ;;  %v1042_v7 = vsel %vm1038_vm7, %v1037_v3, %v2126_v55  ;;  %v1073_v38 = vsel %vm1072_vm8, %v2171_v5, %v1069_v4  ;;  %v1075_v19 = vsel %vm1072_vm8, %v1069_v4, %v2171_v5 }
 0x2b6   : > { %v1058_v12 = vmul.f32 %v1049_v47, %v1040_v6  ;;  %v1059_v13 = vmul.f32 %v1053_v62, %v1042_v7  ;;  %1723 = vmatprep.subr.bf16.mxu1 %v1722_v37  ;;  %v1090_v27 = vmul.f32 %v1083_v8, %v1073_v38  ;;  %v1091_v39 = vmul.f32 %v1087_v9, %v1075_v19 }
 0x2b7   : > { %1725 = vmatpush1.bf16.msra.mxu1 %v1724_v2  ;;  %v1272_v2 = vld [vmem:[%s2326_s11 + $0x18] sm:$0xff] }
 0x2b8   : > { %v1728_v23 = vpack.c.bf16 %v1058_v12, %v1056_v50  ;;  %v1071_v55 = vpop.permute.xlu1 %1070  ;;  %v1726_v24 = vpack.c.bf16 %v1059_v13, %v1057_v11 }
 0x2b9   : > { %v1074_v52 = vsel %vm1072_vm8, %v2182_v20, %v1071_v55  ;;  %v1076_v53 = vsel %vm1072_vm8, %v1071_v55, %v2182_v20 }
 0x2ba   : > { %v1092_v28 = vmul.f32 %v1083_v8, %v1074_v52  ;;  %v1093_v29 = vmul.f32 %v1087_v9, %v1076_v53  ;;  %1727 = vmatprep.subr.bf16.mxu1 %v1726_v24 }
 0x2bb   : > { %1729 = vmatpush1.bf16.msra.mxu1 %v1728_v23 }
 0x2bc   : > { %v1732_v30 = vpack.c.bf16 %v1092_v28, %v1090_v27  ;;  %v1730_v5 = vpack.c.bf16 %v1093_v29, %v1091_v39 }
 0x2be   : > { %1731 = vmatprep.subr.bf16.mxu1 %v1730_v5 }
 0x2bf   : > { %1733 = vmatpush1.bf16.msra.mxu1 %v1732_v30 }
 0x2c2   : > { %1221 = vmatmul.mubr.f32.vlgmr.msra.gmra.mrb[4].mxu1 %v1098_v31 }
 0x2c3   : > { %1661 = vmatprep.mubr.msk.f32.mxu1 %vm459_vm0, %v1101_v32 }
 0x2c5   : > { %v578_v20 = vpop.permute.xlu0 %577 }
 0x2c6   : > { %v658_v33 = vadd.f32 %v2073_v21, %v578_v20  ;;  %v660_v34 = vadd.f32 %v2075_v22, %v578_v20  ;;  %1227 = vmatmul.mubr.f32.gmra.mrb[6].mxu1 %v1100_v51 }
 0x2c8   : > { %v1643_v45 = vmul.f32 -1.442695, %v658_v33  ;;  %v1644_v48 = vmul.f32 -1.442695, %v660_v34 }
 0x2c9   : > { %v583_v35 = vpop.permute.xlu1 %582  ;;  %v1143_v3 = vpop.permute.xlu0 %1142 }
 0x2ca   : > { %1802 = vpow2.f32 %v1643_v45  ;;  %v664_v54 = vadd.f32 %v2084_v25, %v583_v35  ;;  %v666_v44 = vadd.f32 %v2086_v26, %v583_v35 }
 0x2cb   : > { %1804 = vpow2.f32 %v1644_v48 }
 0x2cc   : > { %v1645_v56 = vmul.f32 -1.442695, %v664_v54  ;;  %v1646_v15 = vmul.f32 -1.442695, %v666_v44 }
 0x2cd   : > { %v1148_v9 = vpop.permute.xlu1 %1147 }
 0x2ce   : > { %1806 = vpow2.f32 %v1645_v56 }
 0x2cf   : > { %1808 = vpow2.f32 %v1646_v15  ;;  %v1265_v15 = vld [vmem:[%s2325_s10] sm:$0xff] }
 0x2d4   : > { %v1803_v16 = vpop.eup %1802 }
 0x2d5   : > { %v1805_v18 = vpop.eup %1804  ;;  %v680_v46 = vadd.f32 1.0, %v1803_v16 }
 0x2d6   : > { %v681_v21 = vadd.f32 1.0, %v1805_v18 }
 0x2d7   : > { %1810 = vrcp.f32 %v680_v46 }
 0x2d8   : > { %v1807_v57 = vpop.eup %1806  ;;  %1812 = vrcp.f32 %v681_v21 }
 0x2d9   : > { %v1809_v22 = vpop.eup %1808  ;;  %v682_v58 = vadd.f32 1.0, %v1807_v57 }
 0x2da   : > { %v683_v59 = vadd.f32 1.0, %v1809_v22  ;;  %v1487_v22 = vpop.permute.xlu1 %1486 }
 0x2db   : > { %1814 = vrcp.f32 %v682_v58 }
 0x2dc   : > { %1816 = vrcp.f32 %v683_v59 }
 0x2e1   : > { %v1811_v25 = vpop.eup %1810 }
 0x2e2   : > { %v1813_v60 = vpop.eup %1812  ;;  %v692_v47 = vmul.f32 %v1811_v25, %v658_v33 }
 0x2e3   : > { %v693_v10 = vmul.f32 %v1813_v60, %v660_v34 }
 0x2e5   : > { %v1815_v26 = vpop.eup %1814 }
 0x2e6   : > { %v1817_v61 = vpop.eup %1816  ;;  %v694_v62 = vmul.f32 %v1815_v26, %v664_v54 }
 0x2e7   : > { %v695_v14 = vmul.f32 %v1817_v61, %v666_v44 }
 0x2e8   : > { %v1736_v17 = vpack.c.bf16 %v694_v62, %v692_v47 }
 0x2e9   : > { %v1734_v63 = vpack.c.bf16 %v695_v14, %v693_v10 }
 0x2eb   : > { %1735 = vmatprep.subr.bf16.mxu0 %v1734_v63 }
 0x2ec   : > { %1737 = vmatpush1.bf16.msra.mxu0 %v1736_v17 }
 0x2ef   : > { %1666 = vmatmul.mubr.msk.f32.vlgmr.msra.gmra.mrb[8].mxu0 %vm459_vm0, %v1269_v36  ;;  %v1497_v36 = vpop.permute.xlu1 %1496 }
 0x2f0   : > { %1355 = vmatprep.mubr.f32.mxu0 %v1874_v0 }
 0x2f3   : > { %1667 = vmatmul.mubr.msk.f32.gmra.mrb[10].mxu0 %vm459_vm0, %v1270_v1 }
 0x2f4   : > { %1361 = vmatprep.mubr.f32.mxu0 %v1874_v0 }
 0x2f7   : > { %1668 = vmatmul.mubr.msk.f32.gmra.mrb[12].mxu0 %vm459_vm0, %v1271_v49 }
 0x2f8   : > { %1367 = vmatprep.mubr.f32.mxu0 %v1874_v0 }
 0x2fb   : > { %1669 = vmatmul.mubr.msk.f32.gmra.mrb[14].mxu0 %vm459_vm0, %v1272_v2 }
 0x2fc   : > { %1450 = vmatprep.mubr.f32.mxu0 %v1874_v0 }
 0x395   : > { %v1222_v4 = vpop.f32.mrb[4].mxu1 }
 0x396   : > { %v1223_v37 = vadd.f32 %v1222_v4, %v1143_v3  ;;  %v1224_v6 = vpop.f32.mrb[5].mxu1 }
 0x397   : > { %v1225_v7 = vadd.f32 %v1224_v6, %v1143_v3 }
 0x398   : > { %v1662_v8 = vmul.f32 -1.442695, %v1223_v37 }
 0x399   : > { %v1663_v50 = vmul.f32 -1.442695, %v1225_v7  ;;  %v1228_v11 = vpop.f32.mrb[6].mxu1 }
 0x39a   : > { %1818 = vpow2.f32 %v1662_v8  ;;  %v1229_v12 = vadd.f32 %v1228_v11, %v1148_v9  ;;  %v1230_v13 = vpop.f32.mrb[7].mxu1 }
 0x39b   : > { %1820 = vpow2.f32 %v1663_v50  ;;  %v1231_v38 = vadd.f32 %v1230_v13, %v1148_v9 }
 0x39c   : > { %v1664_v19 = vmul.f32 -1.442695, %v1229_v12 }
 0x39d   : > { %v1665_v23 = vmul.f32 -1.442695, %v1231_v38 }
 0x39e   : > { %1822 = vpow2.f32 %v1664_v19 }
 0x39f   : > { %1824 = vpow2.f32 %v1665_v23 }
 0x3a4   : > { %v1819_v55 = vpop.eup %1818 }
 0x3a5   : > { %v1821_v24 = vpop.eup %1820  ;;  %v1245_v52 = vadd.f32 1.0, %v1819_v55 }
 0x3a6   : > { %v1246_v53 = vadd.f32 1.0, %v1821_v24 }
 0x3a7   : > { %1826 = vrcp.f32 %v1245_v52 }
 0x3a8   : > { %v1823_v27 = vpop.eup %1822  ;;  %1828 = vrcp.f32 %v1246_v53 }
 0x3a9   : > { %v1825_v39 = vpop.eup %1824  ;;  %v1247_v28 = vadd.f32 1.0, %v1823_v27 }
 0x3aa   : > { %v1248_v29 = vadd.f32 1.0, %v1825_v39 }
 0x3ab   : > { %1830 = vrcp.f32 %v1247_v28 }
 0x3ac   : > { %1832 = vrcp.f32 %v1248_v29 }
 0x3b1   : > { %v1827_v30 = vpop.eup %1826 }
 0x3b2   : > { %v1829_v5 = vpop.eup %1828  ;;  %v1257_v31 = vmul.f32 %v1827_v30, %v1223_v37 }
 0x3b3   : > { %v1258_v51 = vmul.f32 %v1829_v5, %v1225_v7 }
 0x3b4   : > { %v1261_v45 = vadd.f32 %v1257_v31, %v1998_v43  ;;  %v1482_v43 = vpop.permute.xlu0 %1481 }
 0x3b5   : > { %v1831_v32 = vpop.eup %1830  ;;  %v1262_v35 = vadd.f32 %v1258_v51, %v1994_v41  ;;  %v1267_v41 = vld [vmem:[%s2325_s10 + $0x10] sm:$0xff] }
 0x3b6   : > { %v1833_v20 = vpop.eup %1832  ;;  %v1259_v33 = vmul.f32 %v1831_v32, %v1229_v12 }
 0x3b7   : > { %v1260_v34 = vmul.f32 %v1833_v20, %v1231_v38 }
 0x3b8   : > { %v1263_v48 = vadd.f32 %v1259_v33, %v1992_v40  ;;  %v1266_v40 = vld [vmem:[%s2325_s10 + $0x8] sm:$0xff]  ;;  %v1492_v61 = vpop.permute.xlu0 %1491 }
 0x3b9   : > { %v1264_v54 = vadd.f32 %v1260_v34, %v1996_v42  ;;  %v1268_v42 = vld [vmem:[%s2325_s10 + $0x18] sm:$0xff] }
 0x3ba   : > { %v1740_v44 = vpack.c.bf16 %v1263_v48, %v1261_v45 }
 0x3bb   : > { %v1738_v56 = vpack.c.bf16 %v1264_v54, %v1262_v35 }
 0x3bd   : > { %1739 = vmatprep.subr.bf16.mxu0 %v1738_v56 }
 0x3be   : > { %1741 = vmatpush1.bf16.msra.mxu0 %v1740_v44 }
 0x3c1   : > { %1670 = vmatmul.mubr.msk.f32.vlgmr.msra.gmra.mrb[8].mxu0 %vm459_vm0, %v1265_v15 }
 0x3c2   : > { %1456 = vmatprep.mubr.f32.mxu0 %v1874_v0 }
 0x3c5   : > { %1671 = vmatmul.mubr.msk.f32.gmra.mrb[10].mxu0 %vm459_vm0, %v1266_v40 }
 0x3c6   : > { %1462 = vmatprep.mubr.f32.mxu0 %v1874_v0 }
 0x3c9   : > { %1672 = vmatmul.mubr.msk.f32.gmra.mrb[12].mxu0 %vm459_vm0, %v1267_v41 }
 0x3ca   : > { %1468 = vmatprep.mubr.f32.mxu0 %v1874_v0 }
 0x3cd   : > { %1673 = vmatmul.mubr.msk.f32.gmra.mrb[14].mxu0 %vm459_vm0, %v1268_v42 }
 0x494   : > { %v1452_v16 = vpop.f32.mrb[8].mxu0 }
 0x495   : > { %v1499_v18 = vadd.f32 %v1482_v43, %v1452_v16  ;;  %v1454_v46 = vpop.f32.mrb[9].mxu0 }
 0x496   : > { %v1500_v21 = vadd.f32 %v1482_v43, %v1454_v46 }
 0x497   : > { %v1674_v57 = vmul.f32 -1.442695, %v1499_v18 }
 0x498   : > { %v1675_v58 = vmul.f32 -1.442695, %v1500_v21  ;;  %v1458_v59 = vpop.f32.mrb[10].mxu0 }
 0x499   : > { %1834 = vpow2.f32 %v1674_v57  ;;  %v1501_v25 = vadd.f32 %v1487_v22, %v1458_v59  ;;  %v1460_v60 = vpop.f32.mrb[11].mxu0 }
 0x49a   : > { %1836 = vpow2.f32 %v1675_v58  ;;  %v1502_v0 = vadd.f32 %v1487_v22, %v1460_v60 }
 0x49b   : > { %v1676_v26 = vmul.f32 -1.442695, %v1501_v25 }
 0x49c   : > { %v1677_v47 = vmul.f32 -1.442695, %v1502_v0  ;;  %v1464_v62 = vpop.f32.mrb[12].mxu0 }
 0x49d   : > { %1838 = vpow2.f32 %v1676_v26  ;;  %v1503_v10 = vadd.f32 %v1492_v61, %v1464_v62  ;;  %v1466_v14 = vpop.f32.mrb[13].mxu0 }
 0x49e   : > { %1840 = vpow2.f32 %v1677_v47  ;;  %v1504_v17 = vadd.f32 %v1492_v61, %v1466_v14 }
 0x49f   : > { %v1678_v63 = vmul.f32 -1.442695, %v1503_v10 }
 0x4a0   : > { %v1679_v1 = vmul.f32 -1.442695, %v1504_v17  ;;  %v1470_v49 = vpop.f32.mrb[14].mxu0 }
 0x4a1   : > { %1842 = vpow2.f32 %v1678_v63  ;;  %v1505_v2 = vadd.f32 %v1497_v36, %v1470_v49  ;;  %v1472_v3 = vpop.f32.mrb[15].mxu0 }
 0x4a2   : > { %1844 = vpow2.f32 %v1679_v1  ;;  %v1506_v4 = vadd.f32 %v1497_v36, %v1472_v3 }
 0x4a3   : > { %v1835_v37 = vpop.eup %1834  ;;  %v1680_v6 = vmul.f32 -1.442695, %v1505_v2 }
 0x4a4   : > { %v1837_v7 = vpop.eup %1836  ;;  %v1531_v8 = vadd.f32 1.0, %v1835_v37  ;;  %v1681_v9 = vmul.f32 -1.442695, %v1506_v4 }
 0x4a5   : > { %v1532_v50 = vadd.f32 1.0, %v1837_v7  ;;  %1846 = vpow2.f32 %v1680_v6 }
 0x4a6   : > { %1848 = vrcp.f32 %v1531_v8 }
 0x4a7   : > { %v1839_v11 = vpop.eup %1838  ;;  %1850 = vrcp.f32 %v1532_v50 }
 0x4a8   : > { %v1841_v12 = vpop.eup %1840  ;;  %v1533_v13 = vadd.f32 1.0, %v1839_v11  ;;  %1852 = vpow2.f32 %v1681_v9 }
 0x4a9   : > { %v1534_v38 = vadd.f32 1.0, %v1841_v12 }
 0x4aa   : > { %1854 = vrcp.f32 %v1533_v13 }
 0x4ab   : > { %v1843_v19 = vpop.eup %1842  ;;  %1856 = vrcp.f32 %v1534_v38 }
 0x4ac   : > { %v1845_v23 = vpop.eup %1844  ;;  %v1535_v55 = vadd.f32 1.0, %v1843_v19 }
 0x4ad   : > { %v1536_v24 = vadd.f32 1.0, %v1845_v23 }
 0x4ae   : > { %1858 = vrcp.f32 %v1535_v55 }
 0x4af   : > { %v1847_v52 = vpop.eup %1846  ;;  %1860 = vrcp.f32 %v1536_v24 }
 0x4b0   : > { %v1849_v53 = vpop.eup %1848  ;;  %v1537_v27 = vadd.f32 1.0, %v1847_v52 }
 0x4b1   : > { %v1851_v39 = vpop.eup %1850  ;;  %v1555_v28 = vmul.f32 %v1849_v53, %v1499_v18 }
 0x4b2   : > { %v1853_v29 = vpop.eup %1852  ;;  %v1556_v30 = vmul.f32 %v1851_v39, %v1500_v21  ;;  %1862 = vrcp.f32 %v1537_v27 }
 0x4b3   : > { %1563 = vst [vmem:[%s440_s28] sm:$0xff] %v1555_v28  ;;  %v1538_v5 = vadd.f32 1.0, %v1853_v29 }
 0x4b4   : > { %v1855_v31 = vpop.eup %1854  ;;  %1564 = vst [vmem:[%s440_s28 + $0x8] sm:$0xff] %v1556_v30 }
 0x4b5   : > { %v1857_v32 = vpop.eup %1856  ;;  %v1557_v51 = vmul.f32 %v1855_v31, %v1501_v25  ;;  %1864 = vrcp.f32 %v1538_v5 }
 0x4b6   : > { %v1558_v20 = vmul.f32 %v1857_v32, %v1502_v0 }
 0x4b7   : > { %1565 = vst [vmem:[%s440_s28 + $0x10] sm:$0xff] %v1557_v51 }
 0x4b8   : > { %v1859_v33 = vpop.eup %1858  ;;  %1566 = vst [vmem:[%s440_s28 + $0x18] sm:$0xff] %v1558_v20 }
 0x4b9   : > { %v1861_v34 = vpop.eup %1860  ;;  %v1559_v45 = vmul.f32 %v1859_v33, %v1503_v10 }
 0x4ba   : > { %v1560_v48 = vmul.f32 %v1861_v34, %v1504_v17 }
 0x4bb   : > { %1567 = vst [vmem:[%s440_s28 + $0x20] sm:$0xff] %v1559_v45 }
 0x4bc   : > { %v1863_v35 = vpop.eup %1862  ;;  %1568 = vst [vmem:[%s440_s28 + $0x28] sm:$0xff] %v1560_v48 }
 0x4bd   : > { %v1561_v54 = vmul.f32 %v1863_v35, %v1505_v2 }
 0x4bf   : > { %v1865_v44 = vpop.eup %1864  ;;  %1569 = vst [vmem:[%s440_s28 + $0x30] sm:$0xff] %v1561_v54 }
 0x4c0   : > { %v1562_v56 = vmul.f32 %v1865_v44, %v1506_v4 }
 0x4c2   : > { %1570 = vst [vmem:[%s440_s28 + $0x38] sm:$0xff] %v1562_v56 }
 0x4c3 PF: > { %s23_s25 = sadd.s32 1, %s1872_s25  }
 0x4c4   : > { %p20_p4 = scmp.ge.s32.totalorder %s23_s25, 4  }
 0x4c6   :  { %22 = sbr.rel (!%p20_p4) target bundleno = 1 (0x1), region = 109 }

</bundles_post_ra>
